<compile_context>
chip_gen: v7x
topology: tpu7x:2x2x1
jax: 0.10.0
libtpu: 0.0.40
codegen_flags: <defaults>
</compile_context>

<pallas_src>
import functools

import jax
import jax.numpy as jnp
from jax.experimental import pallas as pl
from jax.experimental.pallas import tpu as pltpu


def _softplus(x):
    # numerically-stable softplus, matches F.softplus semantics
    return jnp.maximum(x, 0.0) + jnp.log1p(jnp.exp(-jnp.abs(x)))


def _gmm_head_kernel(x_ref, w1_ref, b1_ref, w2_ref, b2_ref, out_ref, *, G, GA):
    # x: (row_tile, D) bf16 ; w1: (D, 3H) bf16 ; b1: (1, 3H) f32
    # w2: (3H, OUT_PAD) bf16 (block-diagonal) ; b2: (1, OUT_PAD) f32
    x = x_ref[...]

    # fused layer 1 for all three branches, f32 accumulate
    h = jnp.dot(x, w1_ref[...], preferred_element_type=jnp.float32) + b1_ref[...]
    h = jnp.maximum(h, 0.0)

    # fused layer 2 (block-diagonal weights keep the branches independent)
    z = jnp.dot(h.astype(jnp.bfloat16), w2_ref[...],
                preferred_element_type=jnp.float32) + b2_ref[...]

    # per-column-range activations: [0,G) identity (pi logits),
    # [G, G+GA) tanh (mu), [G+GA, ...) softplus (sigma). Lane-wise select
    # (VPU) + EUP transcendentals; output store stays lane-dense.
    col = jax.lax.broadcasted_iota(jnp.int32, z.shape, 1)
    out = jnp.where(col < G, z, jnp.where(col < G + GA, jnp.tanh(z), _softplus(z)))
    out_ref[...] = out


def _round_up(v, m):
    return ((v + m - 1) // m) * m


def gmm_head_forward(x, params, *, action_dim, num_gaussians):
    """Returns (pi_logits, mu, sigma) — the parameters of the MixtureOfGaussian."""
    if x.ndim == 2:
        x = x[:, None, :]
    assert x.ndim == 3, x.shape
    B, T, D = x.shape
    N = B * T

    (w1p, b1p, w2p, b2p,
     w1m, b1m, w2m, b2m,
     w1s, b1s, w2s, b2s) = params

    H = w1p.shape[1]
    G = num_gaussians
    A = action_dim
    GA = G * A
    OUT = G + 2 * GA
    OUT_PAD = _round_up(OUT, 128)          # lane-dense output slab

    # ---- pack parameters (cheap; in production fold these once offline) ----
    w1_all = jnp.concatenate([w1p, w1m, w1s], axis=1).astype(jnp.bfloat16)   # (D, 3H)
    b1_all = jnp.concatenate([b1p, b1m, b1s], axis=1).astype(jnp.float32)    # (1, 3H)

    w2_all = jnp.zeros((3 * H, OUT_PAD), jnp.float32)
    w2_all = w2_all.at[0 * H:1 * H, 0:G].set(w2p)
    w2_all = w2_all.at[1 * H:2 * H, G:G + GA].set(w2m)
    w2_all = w2_all.at[2 * H:3 * H, G + GA:G + 2 * GA].set(w2s)
    w2_all = w2_all.astype(jnp.bfloat16)                                     # (3H, OUT_PAD)

    b2_all = jnp.zeros((1, OUT_PAD), jnp.float32)
    b2_all = b2_all.at[:, 0:G].set(b2p)
    b2_all = b2_all.at[:, G:G + GA].set(b2m)
    b2_all = b2_all.at[:, G + GA:G + 2 * GA].set(b2s)                        # (1, OUT_PAD)

    # ---- row tiling: cap tile, pad rows to a tile multiple ----
    ROW_TILE_CAP = 256  # fits double-buffered tiles in v7x's smaller VMEM; grid>=2 for big N
    row_tile = ROW_TILE_CAP if N >= ROW_TILE_CAP else _round_up(N, 16)
    N_pad = _round_up(N, row_tile)

    xf = x.reshape(N, D).astype(jnp.bfloat16)
    if N_pad != N:
        xf = jnp.pad(xf, ((0, N_pad - N), (0, 0)))

    grid = (N_pad // row_tile,)

    kernel = functools.partial(_gmm_head_kernel, G=G, GA=GA)

    out_f = pl.pallas_call(
        kernel,
        grid=grid,
        in_specs=[
            pl.BlockSpec((row_tile, D), lambda i: (i, 0)),
            pl.BlockSpec(w1_all.shape, lambda i: (0, 0)),   # resident across steps
            pl.BlockSpec(b1_all.shape, lambda i: (0, 0)),
            pl.BlockSpec(w2_all.shape, lambda i: (0, 0)),
            pl.BlockSpec(b2_all.shape, lambda i: (0, 0)),
        ],
        out_specs=pl.BlockSpec((row_tile, OUT_PAD), lambda i: (i, 0)),
        out_shape=jax.ShapeDtypeStruct((N_pad, OUT_PAD), jnp.float32),
        compiler_params=pltpu.CompilerParams(
            dimension_semantics=("parallel",)),
    )(xf, w1_all, b1_all, w2_all, b2_all)

    out_f = out_f[:N]
    pi_logits = out_f[:, 0:G].reshape(B, T, G)
    mu = out_f[:, G:G + GA].reshape(B, T, G, A)
    sigma = out_f[:, G + GA:G + 2 * GA].reshape(B, T, G, A)
    return pi_logits, mu, sigma


def _init_params(key, input_dim, hidden_dim, num_gaussians, action_dim):
    """Deterministic synthetic parameters. Weights stored as (in, out)."""
    def linear(k, din, dout):
        kw, kb = jax.random.split(k)
        scale = 1.0 / jnp.sqrt(din)
        w = jax.random.uniform(kw, (din, dout), jnp.float32, -scale, scale)
        b = jax.random.uniform(kb, (1, dout), jnp.float32, -scale, scale)
        return w, b

    keys = jax.random.split(key, 6)
    GA = num_gaussians * action_dim
    w1p, b1p = linear(keys[0], input_dim, hidden_dim)
    w2p, b2p = linear(keys[1], hidden_dim, num_gaussians)
    w1m, b1m = linear(keys[2], input_dim, hidden_dim)
    w2m, b2m = linear(keys[3], hidden_dim, GA)
    w1s, b1s = linear(keys[4], input_dim, hidden_dim)
    w2s, b2s = linear(keys[5], hidden_dim, GA)
    return (w1p, b1p, w2p, b2p, w1m, b1m, w2m, b2m, w1s, b1s, w2s, b2s)


def _reference(x, params, *, action_dim, num_gaussians):
    """f32 reference matching the PyTorch module semantics."""
    if x.ndim == 2:
        x = x[:, None, :]
    B, T, D = x.shape
    (w1p, b1p, w2p, b2p, w1m, b1m, w2m, b2m, w1s, b1s, w2s, b2s) = params
    xf = x.reshape(B * T, D)
    pi = jnp.maximum(xf @ w1p + b1p, 0.0) @ w2p + b2p
    mu = jnp.tanh(jnp.maximum(xf @ w1m + b1m, 0.0) @ w2m + b2m)
    ls = jnp.maximum(xf @ w1s + b1s, 0.0) @ w2s + b2s
    sig = jax.nn.softplus(ls)
    G, A = num_gaussians, action_dim
    return (pi.reshape(B, T, G), mu.reshape(B, T, G, A), sig.reshape(B, T, G, A))


if __name__ == "__main__":
    B, T = 2, 8
    input_dim = 32
    hidden_dim = 32
    num_gaussians = 4
    action_dim = 8

    key = jax.random.PRNGKey(0)
    k_x, k_p = jax.random.split(key)
    x = jax.random.normal(k_x, (B, T, input_dim), jnp.float32)
    params = _init_params(k_p, input_dim, hidden_dim, num_gaussians, action_dim)

    pi_logits, mu, sigma = gmm_head_forward(
        x, params, action_dim=action_dim, num_gaussians=num_gaussians)
    jax.block_until_ready((pi_logits, mu, sigma))

    pi_ref, mu_ref, sig_ref = _reference(
        x, params, action_dim=action_dim, num_gaussians=num_gaussians)

    assert pi_logits.shape == (B, T, num_gaussians)
    assert mu.shape == (B, T, num_gaussians, action_dim)
    assert sigma.shape == (B, T, num_gaussians, action_dim)
    # bf16 matmul inputs (f32 accumulate) -> compare vs f32 reference with
    # tolerance appropriate for bf16 rounding of x / weights.
    assert jnp.allclose(pi_logits, pi_ref, atol=5e-2, rtol=5e-2), \
        float(jnp.max(jnp.abs(pi_logits - pi_ref)))
    assert jnp.allclose(mu, mu_ref, atol=5e-2, rtol=5e-2), \
        float(jnp.max(jnp.abs(mu - mu_ref)))
    assert jnp.allclose(sigma, sig_ref, atol=5e-2, rtol=5e-2), \
        float(jnp.max(jnp.abs(sigma - sig_ref)))

    print("KERNEL_OK")
</pallas_src>

<mosaic_0001>
module attributes {stable_mosaic.version = 11 : i64} {
  func.func @_gmm_head_kernel(%arg0: i32, %arg1: memref<16x32xbf16, #tpu.memory_space<vmem>>, %arg2: memref<32x96xbf16, #tpu.memory_space<vmem>>, %arg3: memref<1x96xf32, #tpu.memory_space<vmem>>, %arg4: memref<96x128xbf16, #tpu.memory_space<vmem>>, %arg5: memref<1x128xf32, #tpu.memory_space<vmem>>, %arg6: memref<16x128xf32, #tpu.memory_space<vmem>>) attributes {dimension_semantics = [#tpu.dimension_semantics<parallel>], iteration_bounds = array<i64: 1>, scalar_prefetch = 0 : i64, scratch_operands = 0 : i64, tpu.core_type = #tpu.core_type<tc>, window_params = [{transform_indices = @transform_0, window_bounds = array<i64: 16, 32>}, {pipeline_mode = #tpu.pipeline_mode<synchronous>, transform_indices = @transform_1, window_bounds = array<i64: 32, 96>}, {pipeline_mode = #tpu.pipeline_mode<synchronous>, transform_indices = @transform_2, window_bounds = array<i64: 1, 96>}, {pipeline_mode = #tpu.pipeline_mode<synchronous>, transform_indices = @transform_3, window_bounds = array<i64: 96, 128>}, {pipeline_mode = #tpu.pipeline_mode<synchronous>, transform_indices = @transform_4, window_bounds = array<i64: 1, 128>}, {transform_indices = @transform_5, window_bounds = array<i64: 16, 128>}]} {
    %c0 = arith.constant 0 : index
    %c0_0 = arith.constant 0 : index
    %0 = vector.load %arg1[%c0, %c0_0] : memref<16x32xbf16, #tpu.memory_space<vmem>>, vector<16x32xbf16>
    %c0_1 = arith.constant 0 : index
    %c0_2 = arith.constant 0 : index
    %1 = vector.load %arg2[%c0_1, %c0_2] : memref<32x96xbf16, #tpu.memory_space<vmem>>, vector<32x96xbf16>
    %cst = arith.constant dense<0.000000e+00> : vector<16x96xf32>
    %2 = tpu.matmul %0, %1, %cst {dimension_numbers = #tpu.dot_dimension_numbers<[1], [0], [0], [1], [0, 0, 1, 1], [], []>} : vector<16x32xbf16>, vector<32x96xbf16>, vector<16x96xf32> -> vector<16x96xf32>
    %c0_3 = arith.constant 0 : index
    %c0_4 = arith.constant 0 : index
    %3 = vector.load %arg3[%c0_3, %c0_4] : memref<1x96xf32, #tpu.memory_space<vmem>>, vector<1x96xf32>
    %4 = vector.broadcast %3 : vector<1x96xf32> to vector<16x96xf32>
    %5 = arith.addf %2, %4 : vector<16x96xf32>
    %cst_5 = arith.constant 0.000000e+00 : f32
    %6 = vector.broadcast %cst_5 : f32 to vector<16x96xf32>
    %7 = arith.maximumf %5, %6 : vector<16x96xf32>
    %8 = arith.truncf %7 : vector<16x96xf32> to vector<16x96xbf16>
    %c0_6 = arith.constant 0 : index
    %c0_7 = arith.constant 0 : index
    %9 = vector.load %arg4[%c0_6, %c0_7] : memref<96x128xbf16, #tpu.memory_space<vmem>>, vector<96x128xbf16>
    %cst_8 = arith.constant dense<0.000000e+00> : vector<16x128xf32>
    %10 = tpu.matmul %8, %9, %cst_8 {dimension_numbers = #tpu.dot_dimension_numbers<[1], [0], [0], [1], [0, 0, 1, 1], [], []>} : vector<16x96xbf16>, vector<96x128xbf16>, vector<16x128xf32> -> vector<16x128xf32>
    %c0_9 = arith.constant 0 : index
    %c0_10 = arith.constant 0 : index
    %11 = vector.load %arg5[%c0_9, %c0_10] : memref<1x128xf32, #tpu.memory_space<vmem>>, vector<1x128xf32>
    %12 = vector.broadcast %11 : vector<1x128xf32> to vector<16x128xf32>
    %13 = arith.addf %10, %12 : vector<16x128xf32>
    %14 = tpu.iota {dimensions = array<i32: 1>} : vector<16x128xi32>
    %c4_i32 = arith.constant 4 : i32
    %15 = vector.broadcast %c4_i32 : i32 to vector<16x128xi32>
    %16 = arith.cmpi slt, %14, %15 : vector<16x128xi32>
    %c36_i32 = arith.constant 36 : i32
    %17 = vector.broadcast %c36_i32 : i32 to vector<16x128xi32>
    %18 = arith.cmpi slt, %14, %17 : vector<16x128xi32>
    %19 = math.tanh %13 : vector<16x128xf32>
    %cst_11 = arith.constant 0.000000e+00 : f32
    %20 = vector.broadcast %cst_11 : f32 to vector<16x128xf32>
    %21 = arith.maximumf %13, %20 : vector<16x128xf32>
    %22 = math.absf %13 : vector<16x128xf32>
    %cst_12 = arith.constant 0.000000e+00 : f32
    %23 = vector.broadcast %cst_12 : f32 to vector<16x128xf32>
    %24 = arith.subf %23, %22 : vector<16x128xf32>
    %25 = math.exp %24 : vector<16x128xf32>
    %26 = math.log1p %25 : vector<16x128xf32>
    %27 = arith.addf %21, %26 : vector<16x128xf32>
    %28 = arith.select %18, %19, %27 : vector<16x128xi1>, vector<16x128xf32>
    %29 = arith.select %16, %13, %28 : vector<16x128xi1>, vector<16x128xf32>
    %c0_13 = arith.constant 0 : index
    %c0_14 = arith.constant 0 : index
    %30 = vector.load %arg6[%c0_13, %c0_14] : memref<16x128xf32, #tpu.memory_space<vmem>>, vector<16x128xf32>
    tpu.vector_store %arg6[%c0_13, %c0_14], %29 {strides = array<i32>} : memref<16x128xf32, #tpu.memory_space<vmem>>, vector<16x128xf32>,
    return
  }
  func.func @transform_0(%arg0: i32) -> (i32, i32) {
    %c0_i32 = arith.constant 0 : i32
    %c0_i32_0 = arith.constant 0 : i32
    return %arg0, %c0_i32 : i32, i32
  }
  func.func @transform_1(%arg0: i32) -> (i32, i32) {
    %c0_i32 = arith.constant 0 : i32
    %c0_i32_0 = arith.constant 0 : i32
    %c0_i32_1 = arith.constant 0 : i32
    return %c0_i32, %c0_i32_0 : i32, i32
  }
  func.func @transform_2(%arg0: i32) -> (i32, i32) {
    %c0_i32 = arith.constant 0 : i32
    %c0_i32_0 = arith.constant 0 : i32
    %c0_i32_1 = arith.constant 0 : i32
    return %c0_i32, %c0_i32_0 : i32, i32
  }
  func.func @transform_3(%arg0: i32) -> (i32, i32) {
    %c0_i32 = arith.constant 0 : i32
    %c0_i32_0 = arith.constant 0 : i32
    %c0_i32_1 = arith.constant 0 : i32
    return %c0_i32, %c0_i32_0 : i32, i32
  }
  func.func @transform_4(%arg0: i32) -> (i32, i32) {
    %c0_i32 = arith.constant 0 : i32
    %c0_i32_0 = arith.constant 0 : i32
    %c0_i32_1 = arith.constant 0 : i32
    return %c0_i32, %c0_i32_0 : i32, i32
  }
  func.func @transform_5(%arg0: i32) -> (i32, i32) {
    %c0_i32 = arith.constant 0 : i32
    %c0_i32_0 = arith.constant 0 : i32
    return %arg0, %c0_i32 : i32, i32
  }
}

</mosaic_0001>

<bundles_post_ra>
// kernel: tpu_custom_call.1
= control target key start
LH: loop header
LB: loop body
LE: loop exit
PB: predicated region body
PF: predicated region fallthrough
CT: control target
= control target key end

     0   :  { %10 = vsyncpa [#allocation3], 0  ;;  %s585_s0 = inlined_call_operand.hbm [shape: bf16[16,32], index: 0, kind: input, shape index: {}]   ;;  %s586_s1 = inlined_call_operand.hbm [shape: bf16[32,96], index: 1, kind: input, shape index: {}]   ;;  %s587_s2 = inlined_call_operand.vmem [shape: f32[1,96], index: 2, kind: input, shape index: {}]   ;;  %s588_s3 = inlined_call_operand.hbm [shape: bf16[96,128], index: 3, kind: input, shape index: {}]   ;;  %s589_s4 = inlined_call_operand.vmem [shape: f32[1,128], index: 4, kind: input, shape index: {}]   ;;  %s590_s5 = inlined_call_operand.hbm [shape: f32[16,128], index: 5, kind: output, shape index: {}]  }
   0x1   :  { %11 = vsyncpa [#allocation6], 0 }
   0x2   :  { %12 = vsyncpa [#allocation4], 0  ;;  %s473_s18 = smov [#allocation5]   ;;  %s474_s20 = smov [#allocation2]  }
   0x3   :  { %s30_s19 = sshll.u32 %s473_s18, 4  ;;  %s18_s21 = sshll.u32 %s474_s20, 4  ;;  %s31_s19 = int_to_ptr.vmem [resolvable:$true] %s30_s19  ;;  %s513_s21 = int_to_ptr.vmem [resolvable:$true] %s18_s21 }
   0x4   :  { %s379_s24 = scalar_lea.hbm %s586_s1, 256 }
   0x5   :  { %p380_p0 = scmp.ne.s32.totalorder %s586_s1, %s379_s24  ;;  %p383_p1 = scmp.lt.u32.totalorder %s379_s24, %s586_s1 }
   0x7   :  { %p385_p2 = pnand %p383_p1, %p380_p0 }
   0x9   :  { %388 = shalt.err (!%p385_p2)
}
   0xa   :  { %s389_s29 = scalar_lea.vmem %s31_s19, 256  ;;  %p394_p4 = scmp.lt.s32.totalorder %s31_s19, %s31_s19 }
   0xb   :  { %p390_p3 = scmp.ne.s32.totalorder %s31_s19, %s389_s29  ;;  %p395_p5 = scmp.lt.s32.totalorder %s389_s29, %s389_s29 }
   0xd   :  { %p396_p6 = por %p395_p5, %p394_p4 }
   0xf   :  { %p397_p7 = pnand %p396_p6, %p390_p3 }
  0x11   :  { %400 = shalt.err (!%p397_p7)
}
  0x12   :  { %s475_s30 = smov 64   ;;  %s476_s6 = smov 4  }
  0x13   :  { %36 = dma.hbm_to_vmem [thread:$0]  %s586_s1, 256, %s31_s19, [#allocation6], %s475_s30, %s475_s30, %s476_s6  }
  0x14   :  { %s401_s11 = scalar_lea.hbm %s585_s0, 128 }
  0x15   :  { %p402_p8 = scmp.ne.s32.totalorder %s585_s0, %s401_s11  ;;  %p405_p9 = scmp.lt.u32.totalorder %s401_s11, %s585_s0 }
  0x17   :  { %p407_p10 = pnand %p405_p9, %p402_p8 }
  0x19   :  { %410 = shalt.err (!%p407_p10)
}
  0x1a   :  { %s411_s16 = scalar_lea.vmem %s513_s21, 128  ;;  %p416_p12 = scmp.lt.s32.totalorder %s513_s21, %s513_s21 }
  0x1b   :  { %p412_p11 = scmp.ne.s32.totalorder %s513_s21, %s411_s16  ;;  %p417_p13 = scmp.lt.s32.totalorder %s411_s16, %s411_s16 }
  0x1d   :  { %p418_p0 = por %p417_p13, %p416_p12 }
  0x1f   :  { %p419_p1 = pnand %p418_p0, %p412_p11 }
  0x21   :  { %422 = shalt.err (!%p419_p1)
}
  0x22   :  { %24 = dma.hbm_to_vmem [thread:$0]  %s585_s0, 128, %s513_s21, [#allocation3], %s475_s30, %s475_s30, %s476_s6  }
  0x23   :  { %s477_s18 = smov [#allocation7]   ;;  %s423_s23 = scalar_lea.hbm %s588_s3, 768 }
  0x24   :  { %s44_s19 = sshll.u32 %s477_s18, 4  ;;  %p424_p2 = scmp.ne.s32.totalorder %s588_s3, %s423_s23  ;;  %s45_s19 = int_to_ptr.vmem [resolvable:$true] %s44_s19 }
  0x25   :  { %p427_p3 = scmp.lt.u32.totalorder %s423_s23, %s588_s3 }
  0x27   :  { %p429_p4 = pnand %p427_p3, %p424_p2 }
  0x29   :  { %432 = shalt.err (!%p429_p4)
}
  0x2a   :  { %s433_s28 = scalar_lea.vmem %s45_s19, 768  ;;  %p438_p6 = scmp.lt.s32.totalorder %s45_s19, %s45_s19 }
  0x2b   :  { %p434_p5 = scmp.ne.s32.totalorder %s45_s19, %s433_s28  ;;  %p439_p7 = scmp.lt.s32.totalorder %s433_s28, %s433_s28 }
  0x2d   :  { %p440_p8 = por %p439_p7, %p438_p6 }
  0x2f   :  { %p441_p9 = pnand %p440_p8, %p434_p5 }
  0x31   :  { %444 = shalt.err (!%p441_p9)
}
  0x32   :  { %50 = dma.hbm_to_vmem [thread:$0]  %s588_s3, 768, %s45_s19, [#allocation6], %s475_s30, %s475_s30, %s476_s6  }
  0x33   :  { %467 = dma.done.wait [#allocation3], 128  }
  0x34   :  { %468 = vsyncadd [#allocation3], 4294967168 }
  0x35   :  { %469 = dma.done.wait [#allocation6], 1024  }
  0x36   :  { %470 = vsyncadd [#allocation6], 4294966272  ;;  %v478_v0 = vmov 0.0   ;;  %vm479_vm0 = vmmov 0   ;;  %v358_v1 = vld [vmem:[#allocation5] sm:$0xff]   ;;  %v359_v2 = vld [vmem:[#allocation5 + $0x8] sm:$0xff]   ;;  %v241_v38 = vlaneseq }
  0x37   :  { %324 = vmatprep.subr.bf16.mxu0 %v478_v0  ;;  %328 = vmatprep.mubr.msk.bf16.mxu0 %vm479_vm0, %v478_v0  ;;  %v361_v3 = vld [vmem:[#allocation7] sm:$0xff]   ;;  %v360_v4 = vld [vmem:[#allocation2] sm:$0xff]   ;;  %vm93_vm1 = vcmask 261120   ;;  %v363_v6 = vld [vmem:[#allocation7 + $0x10] sm:$0xff]   ;;  %vm196_vm2 = vcmask 785408  }
  0x38   :  { %332 = vmatprep.subr.bf16.mxu1 %v478_v0  ;;  %344 = vmatprep.mubr.msk.bf16.mxu1 %vm479_vm0, %v478_v0  ;;  %v362_v5 = vld [vmem:[#allocation7 + $0x8] sm:$0xff]   ;;  %v364_v7 = vld [vmem:[#allocation7 + $0x18] sm:$0xff]   ;;  %v365_v8 = vld [vmem:[#allocation7 + $0x20] sm:$0xff]   ;;  %v242_v42 = vand.u32 127, %v241_v38 }
  0x39   :  { %325 = vmatpush3.bf16.msra.mxu0 %v358_v1  ;;  %333 = vmatpush3.bf16.msra.mxu1 %v361_v3  ;;  %v366_v9 = vld [vmem:[#allocation7 + $0x28] sm:$0xff]  }
  0x3a   :  { %326 = vmatprep.subr.bf16.mxu0 %v478_v0  ;;  %334 = vmatprep.subr.bf16.mxu1 %v478_v0  ;;  %v301_v10 = vld [vmem:[%s587_s2] ss:$0 sm:$0xff]  ;;  %vm244_vm4 = vcmp.lt.s32.totalorder %v242_v42, 36  ;;  %vm243_vm5 = vcmp.lt.s32.totalorder %v242_v42, 4  ;;  %s480_s2 = smov [#allocation8]  }
  0x3b   :  { %v306_v20 = vld [vmem:[%s589_s4] ss:$0 sm:$0xff]  ;;  %s288_s4 = sshll.u32 %s480_s2, 4  ;;  %s289_s4 = int_to_ptr.vmem [resolvable:$true] %s288_s4 }
  0x3c   :  { %s445_s7 = scalar_lea.vmem %s289_s4, 256  ;;  %p450_p11 = scmp.lt.s32.totalorder %s289_s4, %s289_s4 }
  0x3d   :  { %327 = vmatpush3.bf16.msra.mxu0 %v359_v2  ;;  %335 = vmatpush3.bf16.msra.mxu1 %v362_v5  ;;  %p446_p10 = scmp.ne.s32.totalorder %s289_s4, %s445_s7  ;;  %p451_p12 = scmp.lt.s32.totalorder %s445_s7, %s445_s7 }
  0x3e   :  { %336 = vmatprep.subr.bf16.mxu1 %v478_v0 }
  0x3f   :  { %p452_p13 = por %p451_p12, %p450_p11 }
  0x40   :  { %329 = vmatmul.mubr.msk.bf16.vlgmr.msra.gmra.mrb[0].mxu0 %vm93_vm1, %v360_v4 }
  0x41   :  { %337 = vmatpush3.bf16.msra.mxu1 %v363_v6  ;;  %p453_p0 = pnand %p452_p13, %p446_p10 }
  0x42   :  { %338 = vmatprep.subr.bf16.mxu1 %v478_v0 }
  0x45   :  { %339 = vmatpush3.bf16.msra.mxu1 %v364_v7 }
  0x46   :  { %340 = vmatprep.subr.bf16.mxu1 %v478_v0 }
  0x49   :  { %341 = vmatpush3.bf16.msra.mxu1 %v365_v8 }
  0x4a   :  { %342 = vmatprep.subr.bf16.mxu1 %v478_v0 }
  0x4d   :  { %343 = vmatpush3.bf16.msra.mxu1 %v366_v9 }
 0x113   :  { %v131_v11 = vpop.f32.mrb[0].mxu0 }
 0x114   :  { %v132_v12 = vadd.f32 %v301_v10, %v131_v11  ;;  %v330_v13 = vpop.f32.mrb[1].mxu0 }
 0x115   :  { %v134_v14 = vpop.f32.mrb[2].mxu0 }
 0x116   :  { %v135_v15 = vadd.f32 %v301_v10, %v134_v14  ;;  %v331_v16 = vpop.f32.mrb[3].mxu0  ;;  %v138_v17 = vmax.f32 %v132_v12, 0.0 }
 0x118   :  { %v139_v18 = vmax.f32 %v135_v15, 0.0 }
 0x11a   :  { %v140_v19 = vpack.c.bf16 %v139_v18, %v138_v17 }
 0x11c   :  { %345 = vmatmul.mubr.msk.bf16.vlgmr.msra.gmra.mrb[0].mxu1 %vm196_vm2, %v140_v19 }
 0x1ef   :  { %v234_v21 = vpop.f32.mrb[0].mxu1 }
 0x1f0   :  { %v235_v22 = vadd.f32 %v306_v20, %v234_v21  ;;  %v346_v23 = vpop.f32.mrb[1].mxu1 }
 0x1f1   :  { %v237_v24 = vpop.f32.mrb[2].mxu1 }
 0x1f2   :  { %v249_v25 = vand.u32 2147483647, %v235_v22  ;;  %v238_v26 = vadd.f32 %v306_v20, %v237_v24  ;;  %v347_v27 = vpop.f32.mrb[3].mxu1  ;;  %v247_v49 = vmax.f32 %v235_v22, 0.0 }
 0x1f4   :  { %v251_v28 = vsub.f32 0.0, %v249_v25  ;;  %v250_v29 = vand.u32 2147483647, %v238_v26  ;;  %v248_v54 = vmax.f32 %v238_v26, 0.0 }
 0x1f6   :  { %v253_v30 = vmul.f32 1.442695, %v251_v28  ;;  %v252_v31 = vsub.f32 0.0, %v250_v29 }
 0x1f8   :  { %367 = vpow2.f32 %v253_v30  ;;  %v255_v32 = vmul.f32 1.442695, %v252_v31 }
 0x1fa   :  { %369 = vpow2.f32 %v255_v32 }
 0x202   :  { %v368_v33 = vpop.eup %367 }
 0x203   :  { %v257_v34 = vadd.f32 1.0, %v368_v33  ;;  %v260_v37 = vmul.f32 -0.5, %v368_v33  ;;  %v263_v41 = vand.u32 2147483647, %v368_v33 }
 0x204   :  { %v370_v35 = vpop.eup %369 }
 0x205   :  { %371 = vlog2.f32 %v257_v34  ;;  %v266_v36 = vadd.f32 1.0, %v370_v35  ;;  %v269_v39 = vmul.f32 -0.5, %v370_v35  ;;  %v261_v40 = vadd.f32 1.0, %v260_v37 }
 0x206   :  { %v272_v45 = vand.u32 2147483647, %v370_v35  ;;  %vm264_vm3 = vcmp.lt.f32.partialorder %v263_v41, 0.0004427343 }
 0x207   :  { %373 = vlog2.f32 %v266_v36  ;;  %v270_v43 = vadd.f32 1.0, %v269_v39  ;;  %v262_v47 = vmul.f32 %v368_v33, %v261_v40 }
 0x208   :  { %375 = vtanh.f32 %v235_v22  ;;  %vm273_vm6 = vcmp.lt.f32.partialorder %v272_v45, 0.0004427343 }
 0x209   :  { %377 = vtanh.f32 %v238_v26  ;;  %v271_v52 = vmul.f32 %v370_v35, %v270_v43 }
 0x20f   :  { %v372_v44 = vpop.eup %371 }
 0x210   :  { %v259_v46 = vmul.f32 0.6931472, %v372_v44 }
 0x211   :  { %v374_v48 = vpop.eup %373 }
 0x212   :  { %v265_v50 = vsel %vm264_vm3, %v262_v47, %v259_v46  ;;  %v268_v51 = vmul.f32 0.6931472, %v374_v48  ;;  %v376_v55 = vpop.eup %375 }
 0x213   :  { %v275_v53 = vadd.f32 %v265_v50, %v247_v49  ;;  %v378_v59 = vpop.eup %377 }
 0x214   :  { %v274_v56 = vsel %vm273_vm6, %v271_v52, %v268_v51 }
 0x215   :  { %v277_v57 = vsel %vm244_vm4, %v376_v55, %v275_v53  ;;  %v276_v58 = vadd.f32 %v274_v56, %v248_v54 }
 0x216   :  { %v279_v60 = vsel %vm243_vm5, %v235_v22, %v277_v57 }
 0x217   :  { %281 = vst [vmem:[#allocation8] sm:$0xff] %v279_v60  ;;  %v278_v61 = vsel %vm244_vm4, %v378_v59, %v276_v58 }
 0x218   :  { %v280_v62 = vsel %vm243_vm5, %v238_v26, %v278_v61 }
 0x219   :  { %282 = vst [vmem:[#allocation8 + $0x8] sm:$0xff] %v280_v62 }
 0x21a   :  { %456 = shalt.err (!%p453_p0)
}
 0x21b   :  { %s457_s10 = scalar_lea.hbm %s590_s5, 256 }
 0x21c   :  { %p458_p1 = scmp.ne.s32.totalorder %s590_s5, %s457_s10  ;;  %p461_p2 = scmp.lt.u32.totalorder %s457_s10, %s590_s5 }
 0x21e   :  { %p463_p3 = pnand %p461_p2, %p458_p1 }
 0x220   :  { %466 = shalt.err (!%p463_p3)
}
 0x221   :  { %s481_s15 = smov 128   ;;  %s482_s16 = smov 8  }
 0x222   :  { %294 = dma.vmem_to_hbm [thread:$0]  %s289_s4, 256, %s590_s5, [#allocation4], %s481_s15, %s481_s15, %s482_s16  }
 0x223   :  { %471 = dma.done.wait [#allocation4], 256  }
 0x224   :  { %472 = vsyncadd [#allocation4], 4294967040 }
 0x225   :  { %298 = vsyncpa [#allocation3], 1 }
 0x226   :  { %299 = vsyncpa [#allocation6], 1 }
 0x227   :  { %300 = vsyncpa [#allocation4], 1 }

</bundles_post_ra>
